<compile_context>
chip_gen: v7x
topology: tpu7x:2x2x1
jax: 0.10.0
libtpu: 0.0.40
codegen_flags: <defaults>
</compile_context>

<pallas_src>
import functools

import jax
import jax.numpy as jnp
from jax import lax
from jax.experimental import pallas as pl
from jax.experimental.pallas import tpu as pltpu


# ---------------------------------------------------------------------------
# Kernel 1: Gabor-like filter bank generation (VPU + EUP elementwise)
#   params : (n_filt, 4) packed columns [u, w, s, fi]
#   time   : (1, n_time)
#   filt   : (n_filt, n_time)
# ---------------------------------------------------------------------------
def _filt_kernel(p_ref, t_ref, f_ref):
    p = p_ref[...]                       # (n_filt, 4)
    u = p[:, 0:1]
    w = p[:, 1:2] * 3.0                  # matches `w.expand(...) * 3`
    s = p[:, 2:3] * 5.0                  # matches `s.expand(...) * 5`
    fi = p[:, 3:4]
    t = t_ref[...]                       # (1, n_time) -> broadcasts vs (n_filt, 1)
    env = jnp.exp(-3.1314 * jnp.abs(s) * (t - u) ** 2)
    car = jnp.cos(2.0 * 3.1415 * (w * 10.0) * t + fi)
    f_ref[...] = env * car


def make_filters(params, time):
    n_filt = params.shape[0]
    n_time = time.shape[1]
    return pl.pallas_call(
        _filt_kernel,
        out_shape=jax.ShapeDtypeStruct((n_filt, n_time), jnp.float32),
        in_specs=[
            pl.BlockSpec(memory_space=pltpu.MemorySpace.VMEM),
            pl.BlockSpec(memory_space=pltpu.MemorySpace.VMEM),
        ],
        out_specs=pl.BlockSpec(memory_space=pltpu.MemorySpace.VMEM),
    )(params, time)


# ---------------------------------------------------------------------------
# Kernel 2: stride-1 valid conv as im2col + ONE MXU dot per (batch, l_out tile)
#   xc  : (B, C, Lc)   channel-summed (and phase-split when strid > 1) input
#   w2d : (n_filt, K)  K = C * Tt  (filter bank, phase-interleaved if strid > 1)
#   out : (B, n_filt, l_out_pad)
# ---------------------------------------------------------------------------
def _conv_kernel(xc_ref, w_ref, o_ref, patch_ref, *, C, Tt, T_out, n_tiles):
    # xc_ref   : (C, Lc)       full input row for this batch element (resident)
    # w_ref    : (n_filt, K)   resident filter bank
    # o_ref    : (n_filt, T_out) lane-dense output tile
    # patch_ref: (K, T_out)    im2col scratch, fully rewritten every tile
    W = T_out + Tt - 1
    if n_tiles == 1:
        win = xc_ref[...]                                 # (C, W); Lc == W
    else:
        base = pl.multiple_of(pl.program_id(1) * T_out, T_out)
        win = xc_ref[:, pl.ds(base, W)]                   # tile-aligned dynamic start

    # Build the im2col patch matrix once per tile with static lane shifts.
    # (For very large n_time this static unroll could become a fori_loop with
    #  a dynamic-sublane store; tap counts here are small.)
    for c in range(C):                                    # C = 1 or strid (tiny)
        for t in range(Tt):
            r = c * Tt + t
            patch_ref[r:r + 1, :] = lax.slice(win, (c, t), (c + 1, t + T_out))

    # Single MXU dot, contraction K = C*Tt (instead of n_time skinny dots).
    o_ref[...] = jnp.dot(
        w_ref[...], patch_ref[...], preferred_element_type=jnp.float32
    ).astype(o_ref.dtype)


def _conv1d_pallas(xc, w2d, *, n_filt, C, Tt, T_out, l_out_pad):
    B, _, Lc = xc.shape
    K = C * Tt
    n_tiles = l_out_pad // T_out
    kernel = functools.partial(
        _conv_kernel, C=C, Tt=Tt, T_out=T_out, n_tiles=n_tiles
    )
    return pl.pallas_call(
        kernel,
        out_shape=jax.ShapeDtypeStruct((B, n_filt, l_out_pad), jnp.float32),
        grid=(B, n_tiles),
        in_specs=[
            # Full per-batch row: block index is independent of the tile axis,
            # so it is DMA'd once per batch element and stays resident.
            pl.BlockSpec((None, C, Lc), lambda b, j: (b, 0, 0)),
            pl.BlockSpec((n_filt, K), lambda b, j: (0, 0)),
        ],
        out_specs=pl.BlockSpec((None, n_filt, T_out), lambda b, j: (b, 0, j)),
        scratch_shapes=[pltpu.VMEM((K, T_out), jnp.float32)],
        compiler_params=pltpu.CompilerParams(
            dimension_semantics=("parallel", "parallel"),
        ),
    )(xc, w2d)


# ---------------------------------------------------------------------------
# Forward pass of the Wave module
# ---------------------------------------------------------------------------
@functools.partial(jax.jit, static_argnames=("strid",))
def wave_forward(x, u, w, s, fi, time, *, strid=1):
    B, n_in, L = x.shape
    n_filt = u.shape[0]
    n_time = time.shape[1]
    l_out = (L - n_time) // strid + 1

    # 1) filter bank (Pallas)
    params = jnp.concatenate([u, w, s, fi], axis=1)           # (n_filt, 4)
    filt = make_filters(params, time)                          # (n_filt, n_time)

    # 2) weight is `filt` repeated over channels -> sum input over channels
    #    once (free when n_in == 1).
    xs = x[:, 0, :] if n_in == 1 else jnp.sum(x, axis=1)       # (B, L)

    # 3) polyphase split so the kernel is always a stride-1 conv.
    if strid == 1:
        C, Tt = 1, n_time
        w2d = filt                                             # (n_filt, n_time)
    else:
        C = strid
        Tt = -(-n_time // strid)                               # taps per phase
        filt_p = jnp.pad(filt, ((0, 0), (0, Tt * strid - n_time)))
        # w2d[f, r*Tt + q] = filt_p[f, q*strid + r]
        w2d = (
            filt_p.reshape(n_filt, Tt, strid)
            .transpose(0, 2, 1)
            .reshape(n_filt, C * Tt)
        )

    # 4) l_out tiling (lane-dense output blocks).
    if l_out <= 512:
        T_out, l_out_pad = l_out, l_out                        # single full-dim tile
    else:
        T_out = 512
        l_out_pad = ((l_out + T_out - 1) // T_out) * T_out

    # 5) stride-1 input xc: (B, C, Lc) with xc[b, r, m] = xs[b, m*strid + r]
    Lc = l_out_pad + Tt - 1
    need = Lc * strid
    if L >= need:
        xs = xs[:, :need]
    else:
        xs = jnp.pad(xs, ((0, 0), (0, need - L)))
    if strid == 1:
        xc = xs[:, None, :]
    else:
        xc = xs.reshape(B, Lc, strid).transpose(0, 2, 1)       # (B, strid, Lc)

    out = _conv1d_pallas(
        xc, w2d, n_filt=n_filt, C=C, Tt=Tt, T_out=T_out, l_out_pad=l_out_pad
    )
    return out[:, :, :l_out]


class WaveJax:
    """JAX/Pallas equivalent of the PyTorch `Wave` module."""

    def __init__(self, n_filt, n_time, n_in=1, strid=1, key=None):
        if key is None:
            key = jax.random.PRNGKey(0)
        self.n_filt, self.n_time, self.n_in, self.strid = n_filt, n_time, n_in, strid
        k1, k2, k3, k4 = jax.random.split(key, 4)
        self.u = jax.random.normal(k1, (n_filt, 1), jnp.float32)
        self.w = jax.random.normal(k2, (n_filt, 1), jnp.float32)
        self.s = jax.random.normal(k3, (n_filt, 1), jnp.float32)
        self.fi = jax.random.normal(k4, (n_filt, 1), jnp.float32)
        # time = ((arange(n_time)[None, :] + 1 - n_time/2) / 100)
        self.time = (
            (jnp.arange(n_time, dtype=jnp.float32)[None, :] + 1.0 - n_time / 2.0)
            / 100.0
        )

    def __call__(self, x):
        return wave_forward(
            x, self.u, self.w, self.s, self.fi, self.time, strid=self.strid
        )

    def return_filt(self):
        params = jnp.concatenate([self.u, self.w, self.s, self.fi], axis=1)
        return make_filters(params, self.time)


if __name__ == "__main__":
    def reference(x, u, w, s, fi, time, strid):
        filt = (
            jnp.exp(-3.1314 * jnp.abs(s * 5.0) * (time - u) ** 2)
            * jnp.cos(2.0 * 3.1415 * (w * 3.0) * 10.0 * time + fi)
        )
        B, n_in, L = x.shape
        n_filt, n_time = filt.shape
        l_out = (L - n_time) // strid + 1
        weight = jnp.broadcast_to(filt[:, None, :], (n_filt, n_in, n_time))
        patches = jnp.stack(
            [x[:, :, o * strid: o * strid + n_time] for o in range(l_out)], axis=2
        )
        return jnp.einsum("bcot,fct->bfo", patches, weight)

    key = jax.random.PRNGKey(0)

    # Case 1: stride 1 (default path)
    batch, n_in, length = 2, 4, 16
    n_filt, n_time, strid = 8, 8, 1
    kx, kp = jax.random.split(key)
    x = jax.random.normal(kx, (batch, n_in, length), jnp.float32)
    model = WaveJax(n_filt, n_time, n_in=n_in, strid=strid, key=kp)
    out = jax.block_until_ready(model(x))
    ref = reference(x, model.u, model.w, model.s, model.fi, model.time, strid)
    l_out = (length - n_time) // strid + 1
    assert out.shape == (batch, n_filt, l_out), out.shape
    assert jnp.allclose(out, ref, atol=1e-4, rtol=1e-4), float(
        jnp.max(jnp.abs(out - ref))
    )

    # Case 2: stride 2 (polyphase path)
    batch2, n_in2, length2 = 2, 3, 32
    n_filt2, n_time2, strid2 = 8, 6, 2
    kx2, kp2 = jax.random.split(kp)
    x2 = jax.random.normal(kx2, (batch2, n_in2, length2), jnp.float32)
    model2 = WaveJax(n_filt2, n_time2, n_in=n_in2, strid=strid2, key=kp2)
    out2 = jax.block_until_ready(model2(x2))
    ref2 = reference(x2, model2.u, model2.w, model2.s, model2.fi, model2.time, strid2)
    assert out2.shape == ref2.shape, (out2.shape, ref2.shape)
    assert jnp.allclose(out2, ref2, atol=1e-4, rtol=1e-4), float(
        jnp.max(jnp.abs(out2 - ref2))
    )

    print("KERNEL_OK")
</pallas_src>

<mosaic_0001>
module attributes {stable_mosaic.version = 11 : i64} {
  func.func @_filt_kernel(%arg0: memref<8x4xf32, #tpu.memory_space<vmem>>, %arg1: memref<1x8xf32, #tpu.memory_space<vmem>>, %arg2: memref<8x8xf32, #tpu.memory_space<vmem>>) attributes {dimension_semantics = [], scalar_prefetch = 0 : i64, scratch_operands = 0 : i64, tpu.core_type = #tpu.core_type<tc>} {
    %c0 = arith.constant 0 : index
    %c0_0 = arith.constant 0 : index
    %0 = vector.load %arg0[%c0, %c0_0] : memref<8x4xf32, #tpu.memory_space<vmem>>, vector<8x4xf32>
    %1 = vector.extract_strided_slice %0 {offsets = [0, 0], sizes = [8, 1], strides = [1, 1]} : vector<8x4xf32> to vector<8x1xf32>
    %2 = vector.extract_strided_slice %0 {offsets = [0, 1], sizes = [8, 1], strides = [1, 1]} : vector<8x4xf32> to vector<8x1xf32>
    %cst = arith.constant 3.000000e+00 : f32
    %3 = vector.broadcast %cst : f32 to vector<8x1xf32>
    %4 = arith.mulf %2, %3 : vector<8x1xf32>
    %5 = vector.extract_strided_slice %0 {offsets = [0, 2], sizes = [8, 1], strides = [1, 1]} : vector<8x4xf32> to vector<8x1xf32>
    %cst_1 = arith.constant 5.000000e+00 : f32
    %6 = vector.broadcast %cst_1 : f32 to vector<8x1xf32>
    %7 = arith.mulf %5, %6 : vector<8x1xf32>
    %8 = vector.extract_strided_slice %0 {offsets = [0, 3], sizes = [8, 1], strides = [1, 1]} : vector<8x4xf32> to vector<8x1xf32>
    %c0_2 = arith.constant 0 : index
    %c0_3 = arith.constant 0 : index
    %9 = vector.load %arg1[%c0_2, %c0_3] : memref<1x8xf32, #tpu.memory_space<vmem>>, vector<1x8xf32>
    %10 = math.absf %7 : vector<8x1xf32>
    %cst_4 = arith.constant -3.131400e+00 : f32
    %11 = vector.broadcast %cst_4 : f32 to vector<8x1xf32>
    %12 = arith.mulf %11, %10 : vector<8x1xf32>
    %13 = vector.broadcast %9 : vector<1x8xf32> to vector<8x8xf32>
    %14 = vector.broadcast %1 : vector<8x1xf32> to vector<8x8xf32>
    %15 = arith.subf %13, %14 : vector<8x8xf32>
    %16 = arith.mulf %15, %15 : vector<8x8xf32>
    %17 = vector.broadcast %12 : vector<8x1xf32> to vector<8x8xf32>
    %18 = arith.mulf %17, %16 : vector<8x8xf32>
    %19 = math.exp %18 : vector<8x8xf32>
    %cst_5 = arith.constant 1.000000e+01 : f32
    %20 = vector.broadcast %cst_5 : f32 to vector<8x1xf32>
    %21 = arith.mulf %4, %20 : vector<8x1xf32>
    %cst_6 = arith.constant 6.28299999 : f32
    %22 = vector.broadcast %cst_6 : f32 to vector<8x1xf32>
    %23 = arith.mulf %22, %21 : vector<8x1xf32>
    %24 = vector.broadcast %23 : vector<8x1xf32> to vector<8x8xf32>
    %25 = vector.broadcast %9 : vector<1x8xf32> to vector<8x8xf32>
    %26 = arith.mulf %24, %25 : vector<8x8xf32>
    %27 = vector.broadcast %8 : vector<8x1xf32> to vector<8x8xf32>
    %28 = arith.addf %26, %27 : vector<8x8xf32>
    %29 = math.cos %28 : vector<8x8xf32>
    %30 = arith.mulf %19, %29 : vector<8x8xf32>
    %c0_7 = arith.constant 0 : index
    %c0_8 = arith.constant 0 : index
    %31 = vector.load %arg2[%c0_7, %c0_8] : memref<8x8xf32, #tpu.memory_space<vmem>>, vector<8x8xf32>
    tpu.vector_store %arg2[%c0_7, %c0_8], %30 {strides = array<i32>} : memref<8x8xf32, #tpu.memory_space<vmem>>, vector<8x8xf32>,
    return
  }
}

module attributes {stable_mosaic.version = 11 : i64} {
  func.func @_conv_kernel(%arg0: i32, %arg1: i32, %arg2: memref<1x1x16xf32, #tpu.memory_space<vmem>>, %arg3: memref<8x8xf32, #tpu.memory_space<vmem>>, %arg4: memref<1x8x9xf32, #tpu.memory_space<vmem>>, %arg5: memref<8x9xf32, #tpu.memory_space<vmem>>) attributes {dimension_semantics = [#tpu.dimension_semantics<parallel>, #tpu.dimension_semantics<parallel>], iteration_bounds = array<i64: 2, 1>, scalar_prefetch = 0 : i64, scratch_operands = 1 : i64, tpu.core_type = #tpu.core_type<tc>, window_params = [{transform_indices = @transform_0, window_bounds = array<i64: 1, 1, 16>}, {pipeline_mode = #tpu.pipeline_mode<synchronous>, transform_indices = @transform_1, window_bounds = array<i64: 8, 8>}, {transform_indices = @transform_2, window_bounds = array<i64: 1, 8, 9>}]} {
    %c0 = arith.constant 0 : index
    %c0_0 = arith.constant 0 : index
    %c0_1 = arith.constant 0 : index
    %0 = vector.load %arg2[%c0, %c0_0, %c0_1] : memref<1x1x16xf32, #tpu.memory_space<vmem>>, vector<1x1x16xf32>
    %1 = vector.shape_cast %0 : vector<1x1x16xf32> to vector<1x16xf32>
    %2 = vector.extract_strided_slice %1 {offsets = [0, 0], sizes = [1, 9], strides = [1, 1]} : vector<1x16xf32> to vector<1x9xf32>
    %c0_2 = arith.constant 0 : index
    %c0_3 = arith.constant 0 : index
    %3 = vector.load %arg5[%c0_2, %c0_3] : memref<8x9xf32, #tpu.memory_space<vmem>>, vector<1x9xf32>
    tpu.vector_store %arg5[%c0_2, %c0_3], %2 {strides = array<i32>} : memref<8x9xf32, #tpu.memory_space<vmem>>, vector<1x9xf32>,
    %4 = vector.extract_strided_slice %1 {offsets = [0, 1], sizes = [1, 9], strides = [1, 1]} : vector<1x16xf32> to vector<1x9xf32>
    %c1 = arith.constant 1 : index
    %c0_4 = arith.constant 0 : index
    %5 = vector.load %arg5[%c1, %c0_4] : memref<8x9xf32, #tpu.memory_space<vmem>>, vector<1x9xf32>
    tpu.vector_store %arg5[%c1, %c0_4], %4 {strides = array<i32>} : memref<8x9xf32, #tpu.memory_space<vmem>>, vector<1x9xf32>,
    %6 = vector.extract_strided_slice %1 {offsets = [0, 2], sizes = [1, 9], strides = [1, 1]} : vector<1x16xf32> to vector<1x9xf32>
    %c2 = arith.constant 2 : index
    %c0_5 = arith.constant 0 : index
    %7 = vector.load %arg5[%c2, %c0_5] : memref<8x9xf32, #tpu.memory_space<vmem>>, vector<1x9xf32>
    tpu.vector_store %arg5[%c2, %c0_5], %6 {strides = array<i32>} : memref<8x9xf32, #tpu.memory_space<vmem>>, vector<1x9xf32>,
    %8 = vector.extract_strided_slice %1 {offsets = [0, 3], sizes = [1, 9], strides = [1, 1]} : vector<1x16xf32> to vector<1x9xf32>
    %c3 = arith.constant 3 : index
    %c0_6 = arith.constant 0 : index
    %9 = vector.load %arg5[%c3, %c0_6] : memref<8x9xf32, #tpu.memory_space<vmem>>, vector<1x9xf32>
    tpu.vector_store %arg5[%c3, %c0_6], %8 {strides = array<i32>} : memref<8x9xf32, #tpu.memory_space<vmem>>, vector<1x9xf32>,
    %10 = vector.extract_strided_slice %1 {offsets = [0, 4], sizes = [1, 9], strides = [1, 1]} : vector<1x16xf32> to vector<1x9xf32>
    %c4 = arith.constant 4 : index
    %c0_7 = arith.constant 0 : index
    %11 = vector.load %arg5[%c4, %c0_7] : memref<8x9xf32, #tpu.memory_space<vmem>>, vector<1x9xf32>
    tpu.vector_store %arg5[%c4, %c0_7], %10 {strides = array<i32>} : memref<8x9xf32, #tpu.memory_space<vmem>>, vector<1x9xf32>,
    %12 = vector.extract_strided_slice %1 {offsets = [0, 5], sizes = [1, 9], strides = [1, 1]} : vector<1x16xf32> to vector<1x9xf32>
    %c5 = arith.constant 5 : index
    %c0_8 = arith.constant 0 : index
    %13 = vector.load %arg5[%c5, %c0_8] : memref<8x9xf32, #tpu.memory_space<vmem>>, vector<1x9xf32>
    tpu.vector_store %arg5[%c5, %c0_8], %12 {strides = array<i32>} : memref<8x9xf32, #tpu.memory_space<vmem>>, vector<1x9xf32>,
    %14 = vector.extract_strided_slice %1 {offsets = [0, 6], sizes = [1, 9], strides = [1, 1]} : vector<1x16xf32> to vector<1x9xf32>
    %c6 = arith.constant 6 : index
    %c0_9 = arith.constant 0 : index
    %15 = vector.load %arg5[%c6, %c0_9] : memref<8x9xf32, #tpu.memory_space<vmem>>, vector<1x9xf32>
    tpu.vector_store %arg5[%c6, %c0_9], %14 {strides = array<i32>} : memref<8x9xf32, #tpu.memory_space<vmem>>, vector<1x9xf32>,
    %16 = vector.extract_strided_slice %1 {offsets = [0, 7], sizes = [1, 9], strides = [1, 1]} : vector<1x16xf32> to vector<1x9xf32>
    %c7 = arith.constant 7 : index
    %c0_10 = arith.constant 0 : index
    %17 = vector.load %arg5[%c7, %c0_10] : memref<8x9xf32, #tpu.memory_space<vmem>>, vector<1x9xf32>
    tpu.vector_store %arg5[%c7, %c0_10], %16 {strides = array<i32>} : memref<8x9xf32, #tpu.memory_space<vmem>>, vector<1x9xf32>,
    %c0_11 = arith.constant 0 : index
    %c0_12 = arith.constant 0 : index
    %18 = vector.load %arg3[%c0_11, %c0_12] : memref<8x8xf32, #tpu.memory_space<vmem>>, vector<8x8xf32>
    %c0_13 = arith.constant 0 : index
    %c0_14 = arith.constant 0 : index
    %19 = vector.load %arg5[%c0_13, %c0_14] : memref<8x9xf32, #tpu.memory_space<vmem>>, vector<8x9xf32>
    %cst = arith.constant dense<0.000000e+00> : vector<8x9xf32>
    %20 = tpu.matmul %18, %19, %cst {dimension_numbers = #tpu.dot_dimension_numbers<[1], [0], [0], [1], [0, 0, 1, 1], [], []>} : vector<8x8xf32>, vector<8x9xf32>, vector<8x9xf32> -> vector<8x9xf32>
    %c0_15 = arith.constant 0 : index
    %c0_16 = arith.constant 0 : index
    %c0_17 = arith.constant 0 : index
    %21 = vector.load %arg4[%c0_15, %c0_16, %c0_17] : memref<1x8x9xf32, #tpu.memory_space<vmem>>, vector<1x8x9xf32>
    %22 = vector.shape_cast %21 : vector<1x8x9xf32> to vector<8x9xf32>
    %23 = vector.shape_cast %20 : vector<8x9xf32> to vector<1x8x9xf32>
    tpu.vector_store %arg4[%c0_15, %c0_16, %c0_17], %23 {strides = array<i32>} : memref<1x8x9xf32, #tpu.memory_space<vmem>>, vector<1x8x9xf32>,
    return
  }
  func.func @transform_0(%arg0: i32, %arg1: i32) -> (i32, i32, i32) {
    %c0_i32 = arith.constant 0 : i32
    %c0_i32_0 = arith.constant 0 : i32
    %c0_i32_1 = arith.constant 0 : i32
    return %arg0, %c0_i32, %c0_i32_0 : i32, i32, i32
  }
  func.func @transform_1(%arg0: i32, %arg1: i32) -> (i32, i32) {
    %c0_i32 = arith.constant 0 : i32
    %c0_i32_0 = arith.constant 0 : i32
    %c0_i32_1 = arith.constant 0 : i32
    return %c0_i32, %c0_i32_0 : i32, i32
  }
  func.func @transform_2(%arg0: i32, %arg1: i32) -> (i32, i32, i32) {
    %c0_i32 = arith.constant 0 : i32
    %c0_i32_0 = arith.constant 0 : i32
    return %arg0, %c0_i32, %arg1 : i32, i32, i32
  }
}

</mosaic_0001>

<bundles_post_ra>
// kernel: wave_forward.2
= control target key start
LH: loop header
LB: loop body
LE: loop exit
PB: predicated region body
PF: predicated region fallthrough
CT: control target
= control target key end

     0   :  { %v190_v0 = vmov 1   ;;  %v191_v2 = vmov 0   ;;  %v192_v8 = vmov 2   ;;  %v193_v10 = vmov 3   ;;  %s249_s0 = inlined_call_operand.vmem [shape: f32[8,4], index: 0, kind: input, shape index: {}]   ;;  %s250_s1 = inlined_call_operand.vmem [shape: f32[1,8], index: 1, kind: input, shape index: {}]   ;;  %s251_s2 = inlined_call_operand.vmem [shape: f32[8,8], index: 2, kind: output, shape index: {}]  }
   0x1   :  { %180 = vset.pattern.permute.xlu0 %v190_v0  ;;  %v11_v1 = vld [vmem:[%s249_s0] sm:$0xff]  ;;  %182 = vset.pattern.permute.xlu1 %v191_v2  ;;  %v194_v26 = vmov 683565275   ;;  %v195_v28 = vmov 2475754826   ;;  %vm155_vm13 = vcmask 64512  }
   0x2   :  { %v12_v3 = vmul.f32 3.0, %v11_v1  ;;  %25 = vperm.xlu1 %182, %v11_v1   ;;  %v13_v4 = vmul.f32 5.0, %v11_v1  ;;  %v221_v12 = vld [vmem:[%s250_s1] ss:$0 sm:$0xff]  ;;  %v196_v31 = vmov 2131351028  }
   0x3   :  { %v197_v34 = vmov 2102212464   ;;  %v198_v37 = vmov 920167782   ;;  %v199_v40 = vmov 1326507024  }
   0x4   :  { %v38_v5 = vmul.f32 10.0, %v12_v3  ;;  %v15_v6 = vand.u32 2147483647, %v13_v4 }
   0x6   :  { %v39_v7 = vmul.f32 6.283, %v38_v5  ;;  %183 = vset.pattern.permute.xlu1 %v192_v8  ;;  %v16_v9 = vmul.f32 -3.1314, %v15_v6 }
   0x8   :  { %42 = vperm.xlu0 %180, %v39_v7   ;;  %32 = vperm.xlu1 %183, %v16_v9  }
   0xc   :  { %181 = vset.pattern.permute.xlu0 %v193_v10 }
   0xd   :  { %47 = vperm.xlu0 %181, %v11_v1  }
  0x87   :  { %v43_v11 = vpop.permute.xlu0 %42 }
  0x88   :  { %v45_v13 = vmul.f32 %v221_v12, %v43_v11 }
  0x8c   :  { %v48_v14 = vpop.permute.xlu0 %47 }
  0x8d   :  { %v224_v15 = vadd.f32 %v48_v14, %v45_v13 }
  0x8f   :  { %v54_v16 = vand.u32 2139095040, %v224_v15  ;;  %v51_v20 = vand.u32 2147483647, %v224_v15  ;;  %vm53_vm7 = vcmp.lt.s32.totalorder %v224_v15, 0  ;;  %vm143_vm12 = vweird.f32 %v224_v15 }
  0x91   :  { %v55_v17 = vshrl.u32 %v54_v16, 23  ;;  %v58_v23 = vand.u32 8388607, %v51_v20  ;;  %vm52_vm8 = vcmp.le.f32.partialorder %v51_v20, 0.7853982 }
  0x93   :  { %v162_v18 = vadd.s32 4294967169, %v55_v17  ;;  %v59_v42 = vor.u32 8388608, %v58_v23 }
  0x95   :  { %v61_v19 = vadd.s32 1, %v162_v18  ;;  %v99_v56 = vshll.u32 %v59_v42, 8 }
  0x97   :  { %vm62_vm0 = vcmp.gt.s32.totalorder %v61_v19, 0 }
  0x98   :  { %v63_v21 = vsel %vm62_vm0, %v61_v19, 0 }
  0x99   :  { %v65_v22 = vand.u32 31, %v63_v21  ;;  %v64_v25 = vshrl.u32 %v63_v21, 5  ;;  %v26_v21 = vpop.permute.xlu1 %25 }
  0x9b   :  { %v66_v24 = vsub.s32 32, %v65_v22  ;;  %v68_v27 = vshll.u32 %v194_v26, %v65_v22  ;;  %v71_v29 = vshll.u32 %v195_v28, %v65_v22  ;;  %v74_v33 = vshll.u32 %v196_v31, %v65_v22 }
  0x9c   :  { %v77_v36 = vshll.u32 %v197_v34, %v65_v22  ;;  %v80_v39 = vshll.u32 %v198_v37, %v65_v22  ;;  %vm83_vm1 = vcmp.lt.s32.totalorder %v64_v25, 1  ;;  %vm86_vm2 = vcmp.lt.s32.totalorder %v64_v25, 4 }
  0x9d   :  { %v69_v30 = vshrl.u32 %v195_v28, %v66_v24  ;;  %v72_v32 = vshrl.u32 %v196_v31, %v66_v24  ;;  %v75_v35 = vshrl.u32 %v197_v34, %v66_v24  ;;  %v78_v38 = vshrl.u32 %v198_v37, %v66_v24 }
  0x9e   :  { %v81_v41 = vshrl.u32 %v199_v40, %v66_v24  ;;  %v67_v51 = vshrl.u32 %v194_v26, %v66_v24  ;;  %vm85_vm3 = vcmp.lt.s32.totalorder %v64_v25, 3  ;;  %vm84_vm4 = vcmp.lt.s32.totalorder %v64_v25, 2 }
  0x9f   :  { %v70_v43 = vor.u32 %v69_v30, %v68_v27  ;;  %v73_v44 = vor.u32 %v72_v32, %v71_v29  ;;  %v76_v45 = vor.u32 %v75_v35, %v74_v33  ;;  %v79_v46 = vor.u32 %v78_v38, %v77_v36  ;;  %v33_v32 = vpop.permute.xlu1 %32 }
  0xa0   :  { %v82_v47 = vor.u32 %v81_v41, %v80_v39  ;;  %v28_v27 = vsub.f32 %v221_v12, %v26_v21 }
  0xa1   :  { %v88_v48 = vsel %vm86_vm2, %v76_v45, 2102212464  ;;  %v91_v49 = vsel %vm83_vm1, %v70_v43, %v73_v44  ;;  %v95_v50 = vsel %vm83_vm1, %v73_v44, %v76_v45  ;;  %v92_v52 = vsel %vm86_vm2, %v79_v46, 920167782 }
  0xa2   :  { %v96_v53 = vsel %vm86_vm2, %v82_v47, 1326507024  ;;  %v93_v54 = vsel %vm85_vm3, %v76_v45, %v92_v52  ;;  %v87_v57 = vsel %vm83_vm1, %v67_v51, %v70_v43  ;;  %v89_v58 = vsel %vm85_vm3, %v73_v44, %v88_v48 }
  0xa3   :  { %v97_v55 = vsel %vm85_vm3, %v79_v46, %v96_v53  ;;  %v94_v59 = vsel %vm84_vm4, %v91_v49, %v93_v54  ;;  %v90_v1 = vsel %vm84_vm4, %v87_v57, %v89_v58  ;;  %v29_v31 = vmul.f32 %v28_v27, %v28_v27 }
  0xa4   :  { %v98_v60 = vsel %vm84_vm4, %v95_v50, %v97_v55  ;;  %v233_v63 = vmul.u32.u64.low %v99_v56, %v94_v59  ;;  %v234_v0 = vmul.u32.u64.high %v99_v56, %v94_v59, %v233_v63  ;;  %v106_v3 = vmul.u32 %v99_v56, %v90_v1 }
  0xa5   :  { %v230_v61 = vmul.u32.u64.low %v99_v56, %v98_v60  ;;  %v231_v62 = vmul.u32.u64.high %v99_v56, %v98_v60, %v230_v61  ;;  %v35_v35 = vmul.f32 %v33_v32, %v29_v31 }
  0xa6   :  { %v109_v2 = vadd.s32 1, %v234_v0 }
  0xa7   :  { %vm108_vm5 = vc.u32 %v231_v62, %v233_v63  ;;  %v107_v17 = vadd.s32 %v233_v63, %v231_v62  ;;  %v36_v39 = vmul.f32 1.442695, %v35_v35 }
  0xa8   :  { %v110_v4 = vsel %vm108_vm5, %v109_v2, %v234_v0 }
  0xa9   :  { %v111_v5 = vadd.s32 %v110_v4, %v106_v3 }
  0xab   :  { %v112_v6 = vadd.s32 536870912, %v111_v5 }
  0xad   :  { %v113_v7 = vshrl.u32 %v112_v6, 30 }
  0xaf   :  { %v114_v8 = vshll.u32 %v113_v7, 30  ;;  %v137_v37 = vsub.s32 4, %v113_v7 }
  0xb1   :  { %v115_v9 = vsub.s32 %v111_v5, %v114_v8  ;;  %v138_v12 = vsel %vm53_vm7, %v137_v37, %v113_v7 }
  0xb2   :  { %v140_v40 = vsel %vm52_vm8, 0, %v138_v12 }
  0xb3   :  { %v117_v10 = vsub.s32 0, %v115_v9  ;;  %v144_v41 = vand.u32 3, %v140_v40 }
  0xb5   :  { %v163_v11 = vmin.u32 %v117_v10, %v115_v9  ;;  %vm149_vm9 = vcmp.eq.s32.totalorder %v144_v41, 2  ;;  %vm146_vm10 = vcmp.eq.s32.totalorder %v144_v41, 0  ;;  %vm145_vm11 = vcmp.lt.s32.totalorder %v144_v41, 2 }
  0xb7   :  { %v119_v13 = vclz %v163_v11 }
  0xb9   :  { %v164_v14 = vadd.s32 4294967294, %v119_v13 }
  0xbb   :  { %vm165_vm6 = vcmp.lt.s32.totalorder %v164_v14, 0 }
  0xbc   :  { %v122_v16 = vsel %vm165_vm6, 0, %v164_v14 }
  0xbd   :  { %v123_v18 = vsub.s32 32, %v122_v16  ;;  %v127_v19 = vsub.s32 4294967266, %v122_v16  ;;  %v124_v22 = vshll.u32 %v115_v9, %v122_v16 }
  0xbf   :  { %v125_v23 = vshrl.u32 %v107_v17, %v123_v18  ;;  %v128_v24 = vadd.s32 127, %v127_v19 }
  0xc1   :  { %v126_v25 = vor.u32 %v125_v23, %v124_v22  ;;  %v129_v26 = vshll.u32 %v128_v24, 23 }
  0xc3   :  { %v130_v28 = vor.u32 4788187, %v129_v26  ;;  %v133_v30 = vcvt.s32.f32 %v126_v25 }
  0xc5   :  { %v131_v29 = vand.u32 2147483647, %v130_v28 }
  0xc7   :  { %v134_v33 = vmul.f32 %v133_v30, %v131_v29 }
  0xc9   :  { %v135_v34 = vxor.u32 2147483648, %v134_v33 }
  0xcb   :  { %v136_v36 = vsel %vm53_vm7, %v135_v34, %v134_v33 }
  0xcc   :  { %v139_v38 = vsel %vm52_vm8, %v224_v15, %v136_v36 }
  0xcd   :  { %184 = vcosq.f32 %v139_v38 }
  0xce   :  { %186 = vsinq.f32 %v139_v38 }
  0xcf   :  { %188 = vpow2.f32 %v36_v39 }
  0xd7   :  { %v185_v42 = vpop.eup %184 }
  0xd8   :  { %v187_v43 = vpop.eup %186  ;;  %v150_v44 = vxor.u32 2147483648, %v185_v42 }
  0xd9   :  { %v147_v45 = vxor.u32 2147483648, %v187_v43  ;;  %v189_v47 = vpop.eup %188 }
  0xda   :  { %v151_v46 = vsel %vm149_vm9, %v150_v44, %v187_v43 }
  0xdb   :  { %v148_v20 = vsel %vm146_vm10, %v185_v42, %v147_v45 }
  0xdc   :  { %v152_v48 = vsel %vm145_vm11, %v148_v20, %v151_v46 }
  0xdd   :  { %v153_v49 = vsel %vm143_vm12, nan, %v152_v48 }
  0xde   :  { %v154_v50 = vmul.f32 %v189_v47, %v153_v49 }
  0xe0   :  { %156 = vst.msk [vmem:[%s251_s2] sm:$0xff] %vm155_vm13, %v154_v50 }

// kernel: wave_forward.3
= control target key start
LH: loop header
LB: loop body
LE: loop exit
PB: predicated region body
PF: predicated region fallthrough
CT: control target
= control target key end

     0   :  { %7 = vsyncpa [#allocation4], 0  ;;  %s654_s0 = inlined_call_operand.vmem [shape: f32[2,1,16], index: 0, kind: input, shape index: {}]   ;;  %s655_s1 = inlined_call_operand.vmem [shape: f32[8,8], index: 1, kind: input, shape index: {}]   ;;  %s656_s2 = inlined_call_operand.hbm [shape: f32[2,8,9], index: 2, kind: output, shape index: {}]  }
   0x1   :  { %9 = vsyncpa [#allocation4 + $0x1], 0  ;;  %s531_s9 = smov 0   ;;  %s533_s10 = smov 0  }
   0x2   :  { %s535_s11 = smov 0   ;;  %s537_s12 = smov 0  }
   0x3   :  { %s539_s13 = smov 0   ;;  %s541_s14 = smov 0  }
   0x4 LB: > { %s344_s15 = sadd.s32 4294967295, %s504_s14   ;;  %s345_s16 = sadd.s32 4294967294, %s504_s14   ;;  %s504_s14 = sphi %s541_s14, %s15_s14   ;;  %s500_s13 = sphi %s539_s13, %s663_s13   ;;  %s496_s12 = sphi %s537_s12, %s662_s12   ;;  %s492_s11 = sphi %s535_s11, %s661_s11   ;;  %s488_s10 = sphi %s533_s10, %s660_s10   ;;  %s484_s9 = sphi %s531_s9, %s659_s9  }
   0x5   : > { %s27_s17 = sadd.s32 1, %s500_s13  ;;  %s83_s18 = sadd.s32 1, %s492_s11 }
   0x6   : > { %p29_p0 = scmp.ge.s32.totalorder %s27_s17, 2  ;;  %p93_p1 = scmp.ne.s32.totalorder %s492_s11, %s488_s10 }
   0x7   : > { %p94_p2 = scmp.eq.s32.totalorder %s344_s15, 1  ;;  %p99_p3 = scmp.ne.s32.totalorder %s488_s10, %s484_s9 }
   0x8   : > { %s665_s17 = smov (%p29_p0, %s27_s17), 0  ;;  %p100_p5 = scmp.eq.s32.totalorder %s345_s16, 1 }
   0x9   : > { %p571_p4 = por %p94_p2, %p93_p1  ;;  %s78_s20 = ssub.s32 %s500_s13, %s665_s17 }
   0xa   : > { %p348_p6 = scmp.ge.s32.totalorder %s504_s14, 1  ;;  %p81_p7 = scmp.eq.s32.totalorder %s78_s20, 0 }
   0xb   : > { %p578_p8 = por %p100_p5, %p99_p3  ;;  %p127_p9 = scmp.lt.s32.totalorder %s504_s14, 3 }
   0xc   : > { %s584_s22 = scalar_select %p81_p7, %s492_s11, %s83_s18  }
   0xd   : > { %p128_p10 = pnand %p348_p6, %p127_p9 }
   0xe   : > { %p147_p11 = scmp.lt.s32.totalorder (!%p128_p10), %s496_s12, 1  ;;  %v154_v0 = vlaneseq (!%p128_p10)  ;;  %vm151_vm0 = vcmask (!%p128_p10), 65536   ;;  %s506_s27 = smov (!%p128_p10), 127   ;;  %v508_v5 = vmov (!%p128_p10), 0.0   ;;  %vm511_vm1 = vmmov (!%p128_p10), 0   ;;  %v186_v13 = vld [vmem:[%s655_s1] sm:$0xff] (!%p128_p10) }
   0xf   : > { %131 = sbr.rel (%p128_p10) target bundleno = 390 (0x186), region = 28  ;;  %s507_s28 = smov (!%p128_p10), 125   ;;  %357 = vmatprep.subr.mxu0 (!%p128_p10), %v508_v5  ;;  %359 = vmatprep.mubr.msk.f32.mxu0 (!%p128_p10), %vm511_vm1, %v508_v5  ;;  %vm188_vm2 = vcmask (!%p128_p10), 64512   ;;  %vm262_vm3 = vcmask (!%p128_p10), 72704  }
  0x10   : > { %v155_v1 = vshrl.u32 (!%p128_p10), %v154_v0, 7  ;;  %s509_s29 = smov (!%p128_p10), 126   ;;  %s510_s30 = smov (!%p128_p10), 124  }
  0x11   : > { %s512_s3 = smov (!%p128_p10), 123   ;;  %s513_s4 = smov (!%p128_p10), 122  }
  0x12   : > { %v156_v2 = vsub.s32 (!%p128_p10), 0, %v155_v1  ;;  %s514_s5 = smov (!%p128_p10), 121   ;;  %s144_s8 = sand.u32 (!%p128_p10), 1, %s488_s10  }
  0x13   : > { %s349_s15 = sshll.u32 (!%p128_p10), %s144_s8, 3  ;;  %s352_s16 = sshll.u32 (!%p128_p10), %s496_s12, 7 }
  0x14   : > { %s146_s18 = scalar_lea.vmem (!%p128_p10), [#allocation3], %s349_s15  ;;  %s607_s25 = scalar_lea.hbm (!%p128_p10), %s656_s2, %s352_s16 }
  0x15   : > { %s279_s20 = sshll.u32 (!%p128_p10), %s146_s18, 4  ;;  %s609_s20 = int_to_ptr.vmem [resolvable:$true] %s279_s20 }
  0x16   : > { %s148_s23 = scalar_select %p147_p11, %s496_s12, 1 }
  0x17   : > { %s515_s12 = smov [#allocation3]  }
  0x18   : > { %s149_s26 = scalar_lea.vmem %s654_s0, %s148_s23 }
  0x19   : > { %v150_v3 = vld [vmem:[%s149_s26] sm:$0x1]  ;;  %s265_s26 = scalar_lea.sflag [#allocation4], %s144_s8 }
  0x1a   : > { %v157_v4 = vrot.slane %v150_v3, %v156_v2  ;;  %152 = vst.msk [vmem:[#allocation2] sm:$0x1] %vm151_vm0, %v150_v3 }
  0x1c   : > { %158 = vrot.lane.b32.xlu0 %v157_v4, %s506_s27  ;;  %166 = vrot.lane.b32.xlu1 %v157_v4, %s507_s28  ;;  %s426_s27 = scalar_lea.vmem %s609_s20, 128  ;;  %s430_s28 = sshll.u32 %s515_s12, 4  ;;  %s431_s28 = int_to_ptr.vmem [resolvable:$false] %s430_s28 }
  0x1d   : > { %p427_p12 = scmp.ne.s32.totalorder %s609_s20, %s426_s27  ;;  %p433_p1 = scmp.lt.s32.totalorder %s609_s20, %s431_s28 }
  0x1f   : > { %p428_p13 = pnand %p427_p12, %p571_p4 }
  0x20   : > { %162 = vrot.lane.b32.xlu0 %v157_v4, %s509_s29  ;;  %170 = vrot.lane.b32.xlu1 %v157_v4, %s510_s30  ;;  %s432_s29 = scalar_lea.vmem %s431_s28, 256 }
  0x21   : > { %p429_p0 = pneg %p428_p13  ;;  %p434_p2 = scmp.lt.s32.totalorder %s432_s29, %s426_s27 }
  0x23   : > { %p435_p3 = por %p434_p2, %p433_p1 }
  0x24   : > { %174 = vrot.lane.b32.xlu0 %v157_v4, %s512_s3  ;;  %178 = vrot.lane.b32.xlu1 %v157_v4, %s513_s4 }
  0x25   : > { %p436_p5 = pnand %p435_p3, %p429_p0 }
  0x28   : > { %182 = vrot.lane.b32.xlu0 %v157_v4, %s514_s5 }
  0x8e   : > { %v159_v6 = vpop.permute.xlu0 %158  ;;  %v167_v7 = vpop.permute.xlu1 %166 }
  0x8f   : > { %161 = vst.msk [vmem:[#allocation2 + $0x1] sm:$0x1] %vm151_vm0, %v159_v6  ;;  %169 = vst.msk [vmem:[#allocation2 + $0x3] sm:$0x1] %vm151_vm0, %v167_v7 }
  0x92   : > { %v163_v8 = vpop.permute.xlu0 %162  ;;  %v171_v9 = vpop.permute.xlu1 %170 }
  0x93   : > { %165 = vst.msk [vmem:[#allocation2 + $0x2] sm:$0x1] %vm151_vm0, %v163_v8  ;;  %173 = vst.msk [vmem:[#allocation2 + $0x4] sm:$0x1] %vm151_vm0, %v171_v9 }
  0x96   : > { %v175_v10 = vpop.permute.xlu0 %174  ;;  %v179_v11 = vpop.permute.xlu1 %178 }
  0x97   : > { %177 = vst.msk [vmem:[#allocation2 + $0x5] sm:$0x1] %vm151_vm0, %v175_v10  ;;  %181 = vst.msk [vmem:[#allocation2 + $0x6] sm:$0x1] %vm151_vm0, %v179_v11 }
  0x9a   : > { %v183_v12 = vpop.permute.xlu0 %182 }
  0x9b   : > { %185 = vst.msk [vmem:[#allocation2 + $0x7] sm:$0x1] %vm151_vm0, %v183_v12 }
  0xa2   : > { %v187_v14 = vld [vmem:[#allocation2] sm:$0xff] }
  0xa3   : > { %358 = vmatpush3.msra.mxu0 %v187_v14 }
  0xa4   : > { %360 = vmatmul.mubr.msk.f32.vlgmr.msra.gmra.mrb[0].mxu0 %vm188_vm2, %v186_v13 }
 0x177   : > { %v258_v15 = vpop.f32.mrb[0].mxu0 }
 0x178   : > { %263 = vst.msk [vmem:[%s146_s18] sm:$0xff] %vm262_vm3, %v258_v15  ;;  %v361_v16 = vpop.f32.mrb[1].mxu0 }
 0x179   : > { %439 = shalt.err (!%p436_p5)
}
 0x17a   : > { %s440_s30 = scalar_lea.hbm %s607_s25, 128  ;;  %s444_s5 = scalar_lea.hbm %s656_s2, 256 }
 0x17b   : > { %p441_p6 = scmp.ne.s32.totalorder %s607_s25, %s440_s30  ;;  %p445_p10 = scmp.lt.u32.totalorder %s607_s25, %s656_s2 }
 0x17c   : > { %p446_p11 = scmp.lt.u32.totalorder %s444_s5, %s440_s30  ;;  %p448_p13 = scmp.lt.u32.totalorder %s440_s30, %s607_s25 }
 0x17d   : > { %p442_p7 = pnand %p441_p6, %p571_p4 }
 0x17e   : > { %p447_p12 = por %p446_p11, %p445_p10 }
 0x17f   : > { %p443_p9 = pneg %p442_p7 }
 0x180   : > { %p449_p0 = por %p448_p13, %p447_p12 }
 0x182   : > { %p450_p1 = pnand %p449_p0, %p443_p9 }
 0x184   : > { %453 = shalt.err (!%p450_p1)
}
 0x185   : > { %362 = dma.vmem_to_hbm [thread:$0]  (%p571_p4), %s609_s20, 128, %s607_s25, %s265_s26  }
 0x186 PF: > { %p368_p2 = scmp.ge.s32.totalorder %s504_s14, 2  ;;  %s291_s8 = sand.u32 1, %s484_s9  }
 0x187   : > { %s292_s15 = scalar_lea.sflag [#allocation4], %s291_s8 }
 0x188   : > { %p365_p3 = pnand %p368_p2, %p578_p8 }
 0x18a   : > { %479 = dma.done.wait (!%p365_p3), %s292_s15, 128  }
 0x18b   : > { %481 = vsyncadd (!%p365_p3), %s292_s15, 4294967168  ;;  %s15_s14 = sadd.s32 1, %s504_s14   ;;  %s659_s9 = smov %s488_s10 }
 0x18c   : > { %p12_p5 = scmp.ge.s32.totalorder %s15_s14, 4   ;;  %s660_s10 = smov %s492_s11 }
 0x18d   : > { %s661_s11 = smov %s584_s22  ;;  %s662_s12 = smov %s500_s13 }
 0x18e   : > { %s663_s13 = smov %s665_s17  ;;  %14 = sbr.rel (!%p12_p5) target bundleno = 4 (0x4), region = 63 }
 0x195   :  { %297 = vsyncpa [#allocation4], 1 }
 0x196   :  { %299 = vsyncpa [#allocation4 + $0x1], 1 }

</bundles_post_ra>
